<compile_context>
chip_gen: v7x
topology: tpu7x:2x2x1
jax: 0.10.0
libtpu: 0.0.40
codegen_flags: <defaults>
</compile_context>

<pallas_src>
import functools

import jax
import jax.numpy as jnp
from jax.experimental import pallas as pl
from jax.experimental.pallas import tpu as pltpu


def _round_up(x, m):
    return ((x + m - 1) // m) * m


def _style_split_kernel(x_ref, w_ref, b_ref, o_ref, *, n_pad):
    # One wide matmul on the MXU, f32 accumulation.
    y = jnp.dot(x_ref[...], w_ref[...], preferred_element_type=jnp.float32)
    y = y + b_ref[...]                       # (1, 3*n_pad) broadcast over sublanes
    # Static, 128-aligned lane slices (free).
    m1 = y[:, 0 * n_pad:1 * n_pad]
    m2 = y[:, 1 * n_pad:2 * n_pad]
    m3 = y[:, 2 * n_pad:3 * n_pad]
    # Combine in f32 on the VPU; start from m3 so one buffer is reused.
    o_ref[...] = (m3 + m1 * m2).astype(o_ref.dtype)


def prepare_style_split_params(weight, bias, lr_multiplier=1.0,
                               compute_dtype=jnp.bfloat16):
    """One-time parameter prep — hoist this out of the per-step call path.

    weight: (3*out_ch, in_ch), bias: (3*out_ch,)   (PyTorch FC layout)
    Returns (w_cat, b_cat, out_ch, n_pad):
      w_cat: (in_ch, 3*n_pad) compute_dtype, pre-scaled/transposed/zero-padded
      b_cat: (1, 3*n_pad) float32, pre-scaled/zero-padded
    """
    out3, in_ch = weight.shape
    assert out3 % 3 == 0
    out_ch = out3 // 3
    n_pad = _round_up(out_ch, 128)           # lane-dense N

    weight_gain = lr_multiplier / (in_ch ** 0.5)   # equalized-LR scaling
    bias_gain = lr_multiplier

    wt = (weight.astype(jnp.float32) * weight_gain).T.reshape(in_ch, 3, out_ch)
    b = (bias.astype(jnp.float32) * bias_gain).reshape(3, out_ch)

    # Zero-pad each chunk's N to n_pad: pad columns stay exactly 0, so the pad
    # region computes 0*0+0=0 (no NaN/Inf leakage) and is sliced off afterwards.
    wt = jnp.pad(wt, ((0, 0), (0, 0), (0, n_pad - out_ch)))
    b = jnp.pad(b, ((0, 0), (0, n_pad - out_ch)))

    w_cat = wt.reshape(in_ch, 3 * n_pad).astype(compute_dtype)
    b_cat = b.reshape(1, 3 * n_pad)          # bias stays f32
    return w_cat, b_cat, out_ch, n_pad


def style_split_apply(x, w_cat, b_cat, out_ch, n_pad, *, tile_b=256):
    """x: (B, in_ch) -> (B, out_ch)."""
    B, in_ch = x.shape
    out_dtype = x.dtype
    compute_dtype = w_cat.dtype

    # 128/256-aligned batch tile for large B, clamped (to a sublane multiple)
    # for small B; pad the batch so the grid divides evenly.
    tile_b = min(tile_b, _round_up(B, 8))
    b_padded = _round_up(B, tile_b)

    xc = x.astype(compute_dtype)
    if b_padded != B:
        xc = jnp.pad(xc, ((0, b_padded - B), (0, 0)))

    grid = (b_padded // tile_b,)

    csize = jnp.dtype(compute_dtype).itemsize
    osize = jnp.dtype(out_dtype).itemsize
    # Double-buffered x/out tiles + resident weights/bias (budget 2x everywhere,
    # then 2x headroom) — kept well under v7x's 64 MiB VMEM.
    vmem_bytes = (2 * tile_b * in_ch * csize
                  + 2 * in_ch * 3 * n_pad * csize
                  + 2 * 3 * n_pad * 4
                  + 2 * tile_b * n_pad * osize)
    vmem_limit = int(min(64 * 1024 * 1024, max(4 * 1024 * 1024, 2 * vmem_bytes)))

    cost = pl.CostEstimate(
        flops=2 * b_padded * in_ch * 3 * n_pad,
        transcendentals=0,
        bytes_accessed=(b_padded * in_ch * csize
                        + in_ch * 3 * n_pad * csize
                        + 3 * n_pad * 4
                        + b_padded * n_pad * osize),
    )

    out_padded = pl.pallas_call(
        functools.partial(_style_split_kernel, n_pad=n_pad),
        out_shape=jax.ShapeDtypeStruct((b_padded, n_pad), out_dtype),
        grid=grid,
        in_specs=[
            pl.BlockSpec((tile_b, in_ch), lambda i: (i, 0)),      # x tile (pipelined)
            pl.BlockSpec((in_ch, 3 * n_pad), lambda i: (0, 0)),   # fused weights (resident)
            pl.BlockSpec((1, 3 * n_pad), lambda i: (0, 0)),       # bias (resident)
        ],
        out_specs=pl.BlockSpec((tile_b, n_pad), lambda i: (i, 0)),
        compiler_params=pltpu.CompilerParams(
            dimension_semantics=("parallel",),
            vmem_limit_bytes=vmem_limit,
        ),
        cost_estimate=cost,
    )(xc, w_cat, b_cat)

    return out_padded[:B, :out_ch]


def style_split(x, weight, bias, lr_multiplier=1.0,
                compute_dtype=jnp.bfloat16, tile_b=256):
    """Convenience wrapper. In a real model, call prepare_style_split_params()
    once at load time and reuse (w_cat, b_cat) across steps."""
    w_cat, b_cat, out_ch, n_pad = prepare_style_split_params(
        weight, bias, lr_multiplier, compute_dtype)
    return style_split_apply(x, w_cat, b_cat, out_ch, n_pad, tile_b=tile_b)


# ----------------------------- references ----------------------------------

def style_split_reference_from_params(x, w_cat, b_cat, out_ch, n_pad):
    """Pure-JAX reference matching the kernel's compute path (bf16 operands,
    f32 accumulation) for a tight correctness check."""
    y = jnp.dot(x.astype(w_cat.dtype), w_cat,
                preferred_element_type=jnp.float32) + b_cat
    m1 = y[:, :n_pad]
    m2 = y[:, n_pad:2 * n_pad]
    m3 = y[:, 2 * n_pad:]
    return (m3 + m1 * m2)[:, :out_ch].astype(x.dtype)


def style_split_reference_f32(x, weight, bias, lr_multiplier=1.0):
    """Full-f32 PyTorch-equivalent reference (loose check vs bf16 matmul)."""
    in_ch = x.shape[1]
    w = weight.astype(jnp.float32) * (lr_multiplier / (in_ch ** 0.5))
    b = bias.astype(jnp.float32) * lr_multiplier
    y = x.astype(jnp.float32) @ w.T + b[None, :]
    out_ch = weight.shape[0] // 3
    m1, m2, m3 = y[:, :out_ch], y[:, out_ch:2 * out_ch], y[:, 2 * out_ch:]
    return (m1 * m2 + m3).astype(x.dtype)


if __name__ == "__main__":
    B, in_channels, out_channels = 8, 32, 16

    key = jax.random.PRNGKey(0)
    kx, kw, kb = jax.random.split(key, 3)
    x = jax.random.normal(kx, (B, in_channels), dtype=jnp.float32)
    # FullyConnectedLayer init: weight ~ N(0,1)/lr_multiplier, bias from bias_init.
    weight = jax.random.normal(kw, (3 * out_channels, in_channels), dtype=jnp.float32)
    bias = 0.1 * jax.random.normal(kb, (3 * out_channels,), dtype=jnp.float32)

    # One-time prep (hoisted), then the kernel call.
    w_cat, b_cat, out_ch, n_pad = prepare_style_split_params(weight, bias)
    out = style_split_apply(x, w_cat, b_cat, out_ch, n_pad)
    out = jax.block_until_ready(out)

    assert out.shape == (B, out_channels)
    assert out.dtype == x.dtype

    # Tight check against a reference that uses the exact same bf16 operands /
    # f32 accumulation path as the kernel.
    ref_same = style_split_reference_from_params(x, w_cat, b_cat, out_ch, n_pad)
    assert jnp.allclose(out, ref_same, atol=1e-3, rtol=1e-3), "mismatch vs matched-precision reference"

    # Loose sanity check against the full-f32 PyTorch-equivalent math
    # (tolerance accounts for bf16 matmul operands).
    ref_f32 = style_split_reference_f32(x, weight, bias)
    assert jnp.allclose(out, ref_f32, atol=2.0, rtol=2e-1), "mismatch vs f32 reference"

    print("KERNEL_OK")
</pallas_src>

<mosaic_0001>
module attributes {stable_mosaic.version = 11 : i64} {
  func.func @_style_split_kernel(%arg0: i32, %arg1: memref<8x32xbf16, #tpu.memory_space<vmem>>, %arg2: memref<32x384xbf16, #tpu.memory_space<vmem>>, %arg3: memref<1x384xf32, #tpu.memory_space<vmem>>, %arg4: memref<8x128xf32, #tpu.memory_space<vmem>>) attributes {dimension_semantics = [#tpu.dimension_semantics<parallel>], iteration_bounds = array<i64: 1>, scalar_prefetch = 0 : i64, scratch_operands = 0 : i64, tpu.core_type = #tpu.core_type<tc>, window_params = [{transform_indices = @transform_0, window_bounds = array<i64: 8, 32>}, {pipeline_mode = #tpu.pipeline_mode<synchronous>, transform_indices = @transform_1, window_bounds = array<i64: 32, 384>}, {pipeline_mode = #tpu.pipeline_mode<synchronous>, transform_indices = @transform_2, window_bounds = array<i64: 1, 384>}, {transform_indices = @transform_3, window_bounds = array<i64: 8, 128>}]} {
    %c0 = arith.constant 0 : index
    %c0_0 = arith.constant 0 : index
    %0 = vector.load %arg1[%c0, %c0_0] : memref<8x32xbf16, #tpu.memory_space<vmem>>, vector<8x32xbf16>
    %c0_1 = arith.constant 0 : index
    %c0_2 = arith.constant 0 : index
    %1 = vector.load %arg2[%c0_1, %c0_2] : memref<32x384xbf16, #tpu.memory_space<vmem>>, vector<32x384xbf16>
    %cst = arith.constant dense<0.000000e+00> : vector<8x384xf32>
    %2 = tpu.matmul %0, %1, %cst {dimension_numbers = #tpu.dot_dimension_numbers<[1], [0], [0], [1], [0, 0, 1, 1], [], []>} : vector<8x32xbf16>, vector<32x384xbf16>, vector<8x384xf32> -> vector<8x384xf32>
    %c0_3 = arith.constant 0 : index
    %c0_4 = arith.constant 0 : index
    %3 = vector.load %arg3[%c0_3, %c0_4] : memref<1x384xf32, #tpu.memory_space<vmem>>, vector<1x384xf32>
    %4 = vector.broadcast %3 : vector<1x384xf32> to vector<8x384xf32>
    %5 = arith.addf %2, %4 : vector<8x384xf32>
    %6 = vector.extract_strided_slice %5 {offsets = [0, 0], sizes = [8, 128], strides = [1, 1]} : vector<8x384xf32> to vector<8x128xf32>
    %7 = vector.extract_strided_slice %5 {offsets = [0, 128], sizes = [8, 128], strides = [1, 1]} : vector<8x384xf32> to vector<8x128xf32>
    %8 = vector.extract_strided_slice %5 {offsets = [0, 256], sizes = [8, 128], strides = [1, 1]} : vector<8x384xf32> to vector<8x128xf32>
    %9 = arith.mulf %6, %7 : vector<8x128xf32>
    %10 = arith.addf %8, %9 : vector<8x128xf32>
    %c0_5 = arith.constant 0 : index
    %c0_6 = arith.constant 0 : index
    %11 = vector.load %arg4[%c0_5, %c0_6] : memref<8x128xf32, #tpu.memory_space<vmem>>, vector<8x128xf32>
    tpu.vector_store %arg4[%c0_5, %c0_6], %10 {strides = array<i32>} : memref<8x128xf32, #tpu.memory_space<vmem>>, vector<8x128xf32>,
    return
  }
  func.func @transform_0(%arg0: i32) -> (i32, i32) {
    %c0_i32 = arith.constant 0 : i32
    %c0_i32_0 = arith.constant 0 : i32
    return %arg0, %c0_i32 : i32, i32
  }
  func.func @transform_1(%arg0: i32) -> (i32, i32) {
    %c0_i32 = arith.constant 0 : i32
    %c0_i32_0 = arith.constant 0 : i32
    %c0_i32_1 = arith.constant 0 : i32
    return %c0_i32, %c0_i32_0 : i32, i32
  }
  func.func @transform_2(%arg0: i32) -> (i32, i32) {
    %c0_i32 = arith.constant 0 : i32
    %c0_i32_0 = arith.constant 0 : i32
    %c0_i32_1 = arith.constant 0 : i32
    return %c0_i32, %c0_i32_0 : i32, i32
  }
  func.func @transform_3(%arg0: i32) -> (i32, i32) {
    %c0_i32 = arith.constant 0 : i32
    %c0_i32_0 = arith.constant 0 : i32
    return %arg0, %c0_i32 : i32, i32
  }
}

</mosaic_0001>

<bundles_post_ra>
// kernel: tpu_custom_call.1
= control target key start
LH: loop header
LB: loop body
LE: loop exit
PB: predicated region body
PF: predicated region fallthrough
CT: control target
= control target key end

     0   :  { %8 = vsyncpa [#allocation3], 0  ;;  %s385_s0 = inlined_call_operand.hbm [shape: bf16[8,32], index: 0, kind: input, shape index: {}]   ;;  %s386_s1 = inlined_call_operand.hbm [shape: bf16[32,384], index: 1, kind: input, shape index: {}]   ;;  %s387_s2 = inlined_call_operand.vmem [shape: f32[1,384], index: 2, kind: input, shape index: {}]   ;;  %s388_s3 = inlined_call_operand.hbm [shape: f32[8,128], index: 3, kind: output, shape index: {}]  }
   0x1   :  { %9 = vsyncpa [#allocation6], 0 }
   0x2   :  { %10 = vsyncpa [#allocation4], 0  ;;  %s311_s12 = smov [#allocation2]   ;;  %s312_s14 = smov [#allocation5]  }
   0x3   :  { %s17_s13 = sshll.u32 %s311_s12, 4  ;;  %s26_s15 = sshll.u32 %s312_s14, 4  ;;  %s18_s13 = int_to_ptr.vmem [resolvable:$true] %s17_s13  ;;  %s339_s15 = int_to_ptr.vmem [resolvable:$true] %s26_s15 }
   0x4   :  { %s239_s18 = scalar_lea.hbm %s385_s0, 64 }
   0x5   :  { %p240_p0 = scmp.ne.s32.totalorder %s385_s0, %s239_s18  ;;  %p243_p1 = scmp.lt.u32.totalorder %s239_s18, %s385_s0 }
   0x7   :  { %p245_p2 = pnand %p243_p1, %p240_p0 }
   0x9   :  { %248 = shalt.err (!%p245_p2)
}
   0xa   :  { %s249_s23 = scalar_lea.vmem %s18_s13, 64  ;;  %p254_p4 = scmp.lt.s32.totalorder %s18_s13, %s18_s13 }
   0xb   :  { %p250_p3 = scmp.ne.s32.totalorder %s18_s13, %s249_s23  ;;  %p255_p5 = scmp.lt.s32.totalorder %s249_s23, %s249_s23 }
   0xd   :  { %p256_p6 = por %p255_p5, %p254_p4 }
   0xf   :  { %p257_p7 = pnand %p256_p6, %p250_p3 }
  0x11   :  { %260 = shalt.err (!%p257_p7)
}
  0x12   :  { %20 = dma.hbm_to_vmem [thread:$0]  %s385_s0, 64, %s18_s13, [#allocation3]  }
  0x13   :  { %s261_s28 = scalar_lea.hbm %s386_s1, 768 }
  0x14   :  { %p262_p8 = scmp.ne.s32.totalorder %s386_s1, %s261_s28  ;;  %p265_p9 = scmp.lt.u32.totalorder %s261_s28, %s386_s1 }
  0x16   :  { %p267_p10 = pnand %p265_p9, %p262_p8 }
  0x18   :  { %270 = shalt.err (!%p267_p10)
}
  0x19   :  { %s271_s6 = scalar_lea.vmem %s339_s15, 768  ;;  %p276_p12 = scmp.lt.s32.totalorder %s339_s15, %s339_s15 }
  0x1a   :  { %p272_p11 = scmp.ne.s32.totalorder %s339_s15, %s271_s6  ;;  %p277_p13 = scmp.lt.s32.totalorder %s271_s6, %s271_s6 }
  0x1c   :  { %p278_p0 = por %p277_p13, %p276_p12 }
  0x1e   :  { %p279_p1 = pnand %p278_p0, %p272_p11 }
  0x20   :  { %282 = shalt.err (!%p279_p1)
}
  0x21   :  { %s313_s0 = smov 192   ;;  %s314_s7 = smov 12  }
  0x22   :  { %32 = dma.hbm_to_vmem [thread:$0]  %s386_s1, 768, %s339_s15, [#allocation6], %s313_s0, %s313_s0, %s314_s7  }
  0x23   :  { %305 = dma.done.wait [#allocation3], 64  }
  0x24   :  { %306 = vsyncadd [#allocation3], 4294967232 }
  0x25   :  { %307 = dma.done.wait [#allocation6], 768  }
  0x26   :  { %308 = vsyncadd [#allocation6], 4294966528  ;;  %v315_v0 = vmov 0.0   ;;  %v316_v1 = vmov 0   ;;  %vm317_vm0 = vmmov 0   ;;  %vm100_vm1 = vcmask 261120  }
  0x27   :  { %215 = vmatprep.subr.bf16.mxu1 %v315_v0  ;;  %136 = vmatprep.mubr.bf16.mxu0 %v316_v1  ;;  %v231_v2 = vld [vmem:[#allocation5 + $0x4] ss:$12 sps:$4 sm:$0xff]   ;;  %v233_v3 = vld [vmem:[#allocation5] ss:$12 sps:$4 sm:$0xff]   ;;  %v234_v4 = vld [vmem:[#allocation5 + $0x8] ss:$12 sps:$4 sm:$0xff]   ;;  %v53_v9 = vlaneseq }
  0x28   :  { %219 = vmatprep.mubr.msk.bf16.mxu1 %vm317_vm0, %v315_v0  ;;  %104 = vmatprep.subr.bf16.mxu0 %v231_v2  ;;  %v235_v5 = vld [vmem:[#allocation5 + $0x1c] ss:$12 sps:$4 sm:$0xff]   ;;  %v237_v6 = vld [vmem:[#allocation5 + $0x18] ss:$12 sps:$4 sm:$0xff]   ;;  %v238_v7 = vld [vmem:[#allocation5 + $0x20] ss:$12 sps:$4 sm:$0xff]  }
  0x29   :  { %105 = vmatpush1.bf16.msra.mxu0 %v233_v3  ;;  %216 = vmatpush3.bf16.msra.mxu1 %v234_v4  ;;  %v42_v8 = vld [vmem:[#allocation2] sm:$0xf]  ;;  %v54_v10 = vshrl.u32 %v53_v9, 7  ;;  %s318_s11 = smov [#allocation7]  }
  0x2a   :  { %106 = vmatprep.subr.bf16.mxu0 %v235_v5  ;;  %217 = vmatprep.subr.bf16.mxu1 %v315_v0  ;;  %v51_v12 = vld [vmem:[%s387_s2] sm:$0x7]  ;;  %s194_s12 = sshll.u32 %s318_s11, 4  ;;  %s195_s12 = int_to_ptr.vmem [resolvable:$true] %s194_s12 }
  0x2b   :  { %v55_v11 = vsub.s32 0, %v54_v10  ;;  %v63_v13 = vsub.s32 2, %v54_v10  ;;  %v59_v14 = vsub.s32 1, %v54_v10  ;;  %s283_s2 = scalar_lea.vmem %s195_s12, 128  ;;  %p288_p3 = scmp.lt.s32.totalorder %s195_s12, %s195_s12 }
  0x2c   :  { %p284_p2 = scmp.ne.s32.totalorder %s195_s12, %s283_s2  ;;  %p289_p4 = scmp.lt.s32.totalorder %s283_s2, %s283_s2 }
  0x2d   :  { %107 = vmatpush1.bf16.msra.mxu0 %v237_v6  ;;  %218 = vmatpush3.bf16.msra.mxu1 %v238_v7  ;;  %v56_v15 = vrot.slane %v51_v12, %v55_v11  ;;  %v64_v16 = vrot.slane %v51_v12, %v63_v13  ;;  %v60_v17 = vrot.slane %v51_v12, %v59_v14 }
  0x2e   :  { %p290_p5 = por %p289_p4, %p288_p3 }
  0x30   :  { %210 = vmatmul.mubr.msk.bf16.vlgmr.msra.gmra.mrb[0].mxu0 %vm100_vm1, %v42_v8  ;;  %220 = vmatmul.mubr.msk.bf16.vlgmr.msra.gmra.mrb[0].mxu1 %vm100_vm1, %v42_v8  ;;  %p291_p6 = pnand %p290_p5, %p284_p2 }
 0x103   :  { %v138_v18 = vpop.f32.mrb[0].mxu0  ;;  %v179_v20 = vpop.f32.mrb[0].mxu1 }
 0x104   :  { %v139_v19 = vadd.f32 %v138_v18, %v56_v15  ;;  %v140_v21 = vpop.f32.mrb[1].mxu0  ;;  %v180_v22 = vadd.f32 %v179_v20, %v64_v16  ;;  %v221_v24 = vpop.f32.mrb[1].mxu1 }
 0x105   :  { %v141_v23 = vadd.f32 %v140_v21, %v60_v17  ;;  %v142_v25 = vpop.f32.mrb[2].mxu0  ;;  %v182_v26 = vpop.f32.mrb[2].mxu1 }
 0x106   :  { %v143_v27 = vpop.f32.mrb[3].mxu0  ;;  %v222_v29 = vpop.f32.mrb[3].mxu1 }
 0x107   :  { %v185_v28 = vmul.f32 %v141_v23, %v139_v19 }
 0x109   :  { %v186_v30 = vadd.f32 %v185_v28, %v180_v22 }
 0x10b   :  { %187 = vst [vmem:[#allocation7] sm:$0xff] %v186_v30 }
 0x10c   :  { %294 = shalt.err (!%p291_p6)
}
 0x10d   :  { %s295_s15 = scalar_lea.hbm %s388_s3, 128 }
 0x10e   :  { %p296_p7 = scmp.ne.s32.totalorder %s388_s3, %s295_s15  ;;  %p299_p8 = scmp.lt.u32.totalorder %s295_s15, %s388_s3 }
 0x110   :  { %p301_p9 = pnand %p299_p8, %p296_p7 }
 0x112   :  { %304 = shalt.err (!%p301_p9)
}
 0x113   :  { %197 = dma.vmem_to_hbm [thread:$0]  %s195_s12, 128, %s388_s3, [#allocation4]  }
 0x114   :  { %309 = dma.done.wait [#allocation4], 128  }
 0x115   :  { %310 = vsyncadd [#allocation4], 4294967168 }
 0x116   :  { %201 = vsyncpa [#allocation3], 1 }
 0x117   :  { %202 = vsyncpa [#allocation6], 1 }
 0x118   :  { %203 = vsyncpa [#allocation4], 1 }

</bundles_post_ra>
